<compile_context>
chip_gen: v7x
topology: tpu7x:2x2x1
jax: 0.10.0
libtpu: 0.0.40
codegen_flags: <defaults>
</compile_context>

<pallas_src>
import jax
import jax.numpy as jnp
from jax.experimental import pallas as pl
from jax.experimental.pallas import tpu as pltpu


def basic_gcn_kernel(
    map_ref,                      # SMEM (N_pred,) int32   -- scalar prefetch
    x_ref,                        # (1, N, Cin)   this batch element's input
    adj_ref,                      # (N, N)        shared adjacency (VMEM-resident)
    w1_ref, b1_ref,               # (2*Cin, H), (1, H)     gcn1 packed [neigh; self]
    band_ref, cb_ref,             # (H, H), (1, H)         conv band + bias row
    w2_ref, b2_ref,               # (2*H, Cin), (1, Cin)   gcn2 packed [neigh; self]
    wm_ref, bm_ref,               # (Cin, y_len), (1, y_len) head Linear
    out_ref,                      # (1, N_pred, y_len)
    act_ref,                      # VMEM scratch (N, Cin)
    g_ref,                        # VMEM scratch (N_pred, Cin)
):
    x = x_ref[0]                                              # (N, Cin)
    adj = adj_ref[...]                                        # (N, N)

    # ---- BatchGCNConv #1 (gcn=False, bias=True) + ReLU ----
    # neigh+self merged:  [adj@x | x] @ [w1n; w1s] + b1
    ax = jnp.dot(adj, x, preferred_element_type=jnp.float32)
    h = (jnp.dot(jnp.concatenate([ax, x], axis=1), w1_ref[...],
                 preferred_element_type=jnp.float32)
         + b1_ref[...])
    h = jnp.maximum(h, 0.0)                                   # (N, H)

    # ---- Conv1d(1->1, k=3, dil=1, pad=1) along hidden axis as band matmul ----
    y = jnp.dot(h, band_ref[...], preferred_element_type=jnp.float32) + cb_ref[...]

    # ---- BatchGCNConv #2 (gcn=False, bias=True) + residual ----
    ay = jnp.dot(adj, y, preferred_element_type=jnp.float32)
    x2 = (jnp.dot(jnp.concatenate([ay, y], axis=1), w2_ref[...],
                  preferred_element_type=jnp.float32)
          + b2_ref[...]
          + x)                                                # (N, Cin)

    # ---- head: ReLU, gather the N_pred mapped rows (SMEM mapping + pl.ds),
    #            head Linear only on gathered rows ----
    act_ref[...] = jnp.maximum(x2, 0.0)
    n_pred = g_ref.shape[0]
    for p in range(n_pred):                                   # tiny static unroll
        g_ref[pl.ds(p, 1), :] = act_ref[pl.ds(map_ref[p], 1), :]
    out_ref[0] = (jnp.dot(g_ref[...], wm_ref[...],
                          preferred_element_type=jnp.float32)
                  + bm_ref[...])


def prepare_constants(params):
    """Pack weights/constants ONCE, outside the per-call jit path."""
    H = params["w1n"].shape[1]
    w = params["conv_w"].astype(jnp.float32)
    # 3-tap conv as tridiagonal band: y[:, j] = w0*h[:,j-1] + w1*h[:,j] + w2*h[:,j+1] + b
    band = (w[0] * jnp.eye(H, k=1, dtype=jnp.float32)
            + w[1] * jnp.eye(H, dtype=jnp.float32)
            + w[2] * jnp.eye(H, k=-1, dtype=jnp.float32))
    return {
        "w1": jnp.concatenate([params["w1n"], params["w1s"]], axis=0).astype(jnp.float32),
        "b1": params["b1"].astype(jnp.float32),
        "band": band,
        "cb": jnp.full((1, H), params["conv_b"][0], dtype=jnp.float32),
        "w2": jnp.concatenate([params["w2n"], params["w2s"]], axis=0).astype(jnp.float32),
        "b2": params["b2"].astype(jnp.float32),
        "wm": params["wm"].astype(jnp.float32),
        "bm": params["bm"].astype(jnp.float32),
    }


def basic_gcn_pallas(inp, adj, mapping, consts):
    """Full Basic_GCN.forward: returns (bs, N_pred * y_len)."""
    bs, N, Cin = inp.shape
    H = consts["b1"].shape[1]
    y_len = consts["wm"].shape[1]
    N_pred = mapping.shape[0]

    grid_spec = pltpu.PrefetchScalarGridSpec(
        num_scalar_prefetch=1,            # mapping -> SMEM, passed to index_maps
        grid=(bs,),
        in_specs=[
            pl.BlockSpec((1, N, Cin),  lambda b, m: (b, 0, 0)),   # per-batch input
            pl.BlockSpec((N, N),       lambda b, m: (0, 0)),      # adj (resident)
            pl.BlockSpec((2 * Cin, H), lambda b, m: (0, 0)),      # w1cat (resident)
            pl.BlockSpec((1, H),       lambda b, m: (0, 0)),      # b1
            pl.BlockSpec((H, H),       lambda b, m: (0, 0)),      # conv band
            pl.BlockSpec((1, H),       lambda b, m: (0, 0)),      # conv bias row
            pl.BlockSpec((2 * H, Cin), lambda b, m: (0, 0)),      # w2cat
            pl.BlockSpec((1, Cin),     lambda b, m: (0, 0)),      # b2
            pl.BlockSpec((Cin, y_len), lambda b, m: (0, 0)),      # head weight
            pl.BlockSpec((1, y_len),   lambda b, m: (0, 0)),      # head bias
        ],
        out_specs=pl.BlockSpec((1, N_pred, y_len), lambda b, m: (b, 0, 0)),
        scratch_shapes=[pltpu.VMEM((N, Cin), jnp.float32),
                        pltpu.VMEM((N_pred, Cin), jnp.float32)],
    )

    out = pl.pallas_call(
        basic_gcn_kernel,
        out_shape=jax.ShapeDtypeStruct((bs, N_pred, y_len), jnp.float32),
        grid_spec=grid_spec,
        compiler_params=pltpu.CompilerParams(
            dimension_semantics=("parallel",),      # batch -> both TCs on v7x
            vmem_limit_bytes=32 * 1024 * 1024,
        ),
    )(
        mapping.astype(jnp.int32),
        inp.astype(jnp.float32), adj.astype(jnp.float32),
        consts["w1"], consts["b1"], consts["band"], consts["cb"],
        consts["w2"], consts["b2"], consts["wm"], consts["bm"],
    )
    # NOTE: out last dim y_len=8 (<128) -> masked stores; negligible here.  At
    # production sizes pack/pad so the stored last dim is a multiple of 128.
    # (bs, N_pred, y_len) -> (bs, N_pred*y_len) is a metadata reshape only.
    return out.reshape(bs, N_pred * y_len)


def basic_gcn_reference(inp, adj, mapping, params):
    """Pure-JAX reference with identical semantics (for verification)."""
    x = jnp.einsum("ij,bjc->bic", adj, inp)
    h = x @ params["w1n"] + params["b1"] + inp @ params["w1s"]
    h = jax.nn.relu(h)
    hp = jnp.pad(h, ((0, 0), (0, 0), (1, 1)))
    w = params["conv_w"]
    y = (w[0] * hp[..., :-2] + w[1] * hp[..., 1:-1] + w[2] * hp[..., 2:]
         + params["conv_b"][0])
    ay = jnp.einsum("ij,bjc->bic", adj, y)
    x2 = ay @ params["w2n"] + params["b2"] + y @ params["w2s"]
    x2 = x2 + inp
    out = jax.nn.relu(x2) @ params["wm"] + params["bm"]
    out = out[:, mapping, :]
    return out.reshape(inp.shape[0], -1)


def init_params(key, Cin, H, y_len):
    ks = jax.random.split(key, 10)
    s = lambda fan_in: 1.0 / jnp.sqrt(fan_in)
    return {
        # gcn1: weight_neigh Linear(Cin->H, bias), weight_self Linear(Cin->H, no bias)
        "w1n": jax.random.uniform(ks[0], (Cin, H), jnp.float32, -s(Cin), s(Cin)),
        "b1": jax.random.uniform(ks[1], (1, H), jnp.float32, -s(Cin), s(Cin)),
        "w1s": jax.random.uniform(ks[2], (Cin, H), jnp.float32, -s(Cin), s(Cin)),
        # tcn1: Conv1d(1,1,3) weight (3,) + bias (1,)
        "conv_w": jax.random.uniform(ks[3], (3,), jnp.float32, -s(3), s(3)),
        "conv_b": jax.random.uniform(ks[4], (1,), jnp.float32, -s(3), s(3)),
        # gcn2: H -> Cin (out_channel == in_channel for the residual)
        "w2n": jax.random.uniform(ks[5], (H, Cin), jnp.float32, -s(H), s(H)),
        "b2": jax.random.uniform(ks[6], (1, Cin), jnp.float32, -s(H), s(H)),
        "w2s": jax.random.uniform(ks[7], (H, Cin), jnp.float32, -s(H), s(H)),
        # Basic_GCN head mlp: Linear(out_channel -> y_len)
        "wm": jax.random.uniform(ks[8], (Cin, y_len), jnp.float32, -s(Cin), s(Cin)),
        "bm": jax.random.uniform(ks[9], (1, y_len), jnp.float32, -s(Cin), s(Cin)),
    }


if __name__ == "__main__":
    # args: gcn in_channel=out_channel=8, hidden_channel=32, activation=True,
    #       fc=False; tcn 1->1 k=3 dil=1 pad=1; y_len=8; args.activation='relu'
    # (dropout is stored by the module but never applied in forward.)
    bs, N, Cin, H, y_len = 2, 16, 8, 32, 8

    key = jax.random.PRNGKey(0)
    k_inp, k_adj, k_par = jax.random.split(key, 3)

    inp = jax.random.normal(k_inp, (bs, N, Cin), jnp.float32)
    adj_raw = jnp.abs(jax.random.normal(k_adj, (N, N), jnp.float32))
    adj = adj_raw / jnp.sum(adj_raw, axis=1, keepdims=True)   # row-normalized
    mapping = jnp.array([0, 3, 5, 10], dtype=jnp.int32)       # N_pred = 4

    params = init_params(k_par, Cin, H, y_len)
    consts = prepare_constants(params)                        # once, outside jit

    fwd = jax.jit(basic_gcn_pallas)
    out = fwd(inp, adj, mapping, consts)
    out = jax.block_until_ready(out)

    ref = basic_gcn_reference(inp, adj, mapping, params)
    assert out.shape == (bs, mapping.shape[0] * y_len), out.shape
    assert jnp.allclose(out, ref, rtol=1e-5, atol=1e-5), \
        f"max err {jnp.max(jnp.abs(out - ref))}"

    print("KERNEL_OK")
</pallas_src>

<mosaic_0001>
module attributes {stable_mosaic.version = 11 : i64} {
  func.func @basic_gcn_kernel(%arg0: i32, %arg1: memref<4xi32, #tpu.memory_space<smem>>, %arg2: memref<1x16x8xf32, #tpu.memory_space<vmem>>, %arg3: memref<16x16xf32, #tpu.memory_space<vmem>>, %arg4: memref<16x32xf32, #tpu.memory_space<vmem>>, %arg5: memref<1x32xf32, #tpu.memory_space<vmem>>, %arg6: memref<32x32xf32, #tpu.memory_space<vmem>>, %arg7: memref<1x32xf32, #tpu.memory_space<vmem>>, %arg8: memref<64x8xf32, #tpu.memory_space<vmem>>, %arg9: memref<1x8xf32, #tpu.memory_space<vmem>>, %arg10: memref<8x8xf32, #tpu.memory_space<vmem>>, %arg11: memref<1x8xf32, #tpu.memory_space<vmem>>, %arg12: memref<1x4x8xf32, #tpu.memory_space<vmem>>, %arg13: memref<16x8xf32, #tpu.memory_space<vmem>>, %arg14: memref<4x8xf32, #tpu.memory_space<vmem>>) attributes {dimension_semantics = [#tpu.dimension_semantics<parallel>], iteration_bounds = array<i64: 2>, scalar_prefetch = 1 : i64, scratch_operands = 2 : i64, tpu.core_type = #tpu.core_type<tc>, window_params = [{transform_indices = @transform_0, window_bounds = array<i64: 1, 16, 8>}, {pipeline_mode = #tpu.pipeline_mode<synchronous>, transform_indices = @transform_1, window_bounds = array<i64: 16, 16>}, {pipeline_mode = #tpu.pipeline_mode<synchronous>, transform_indices = @transform_2, window_bounds = array<i64: 16, 32>}, {pipeline_mode = #tpu.pipeline_mode<synchronous>, transform_indices = @transform_3, window_bounds = array<i64: 1, 32>}, {pipeline_mode = #tpu.pipeline_mode<synchronous>, transform_indices = @transform_4, window_bounds = array<i64: 32, 32>}, {pipeline_mode = #tpu.pipeline_mode<synchronous>, transform_indices = @transform_5, window_bounds = array<i64: 1, 32>}, {pipeline_mode = #tpu.pipeline_mode<synchronous>, transform_indices = @transform_6, window_bounds = array<i64: 64, 8>}, {pipeline_mode = #tpu.pipeline_mode<synchronous>, transform_indices = @transform_7, window_bounds = array<i64: 1, 8>}, {pipeline_mode = #tpu.pipeline_mode<synchronous>, transform_indices = @transform_8, window_bounds = array<i64: 8, 8>}, {pipeline_mode = #tpu.pipeline_mode<synchronous>, transform_indices = @transform_9, window_bounds = array<i64: 1, 8>}, {transform_indices = @transform_10, window_bounds = array<i64: 1, 4, 8>}]} {
    %c0 = arith.constant 0 : index
    %c0_0 = arith.constant 0 : index
    %c0_1 = arith.constant 0 : index
    %0 = vector.load %arg2[%c0, %c0_0, %c0_1] : memref<1x16x8xf32, #tpu.memory_space<vmem>>, vector<1x16x8xf32>
    %1 = vector.shape_cast %0 : vector<1x16x8xf32> to vector<16x8xf32>
    %c0_2 = arith.constant 0 : index
    %c0_3 = arith.constant 0 : index
    %2 = vector.load %arg3[%c0_2, %c0_3] : memref<16x16xf32, #tpu.memory_space<vmem>>, vector<16x16xf32>
    %cst = arith.constant dense<0.000000e+00> : vector<16x8xf32>
    %3 = tpu.matmul %2, %1, %cst {dimension_numbers = #tpu.dot_dimension_numbers<[1], [0], [0], [1], [0, 0, 1, 1], [], []>} : vector<16x16xf32>, vector<16x8xf32>, vector<16x8xf32> -> vector<16x8xf32>
    %4 = tpu.concatenate %3, %1 in 1 : vector<16x8xf32>, vector<16x8xf32> -> vector<16x16xf32>
    %c0_4 = arith.constant 0 : index
    %c0_5 = arith.constant 0 : index
    %5 = vector.load %arg4[%c0_4, %c0_5] : memref<16x32xf32, #tpu.memory_space<vmem>>, vector<16x32xf32>
    %cst_6 = arith.constant dense<0.000000e+00> : vector<16x32xf32>
    %6 = tpu.matmul %4, %5, %cst_6 {dimension_numbers = #tpu.dot_dimension_numbers<[1], [0], [0], [1], [0, 0, 1, 1], [], []>} : vector<16x16xf32>, vector<16x32xf32>, vector<16x32xf32> -> vector<16x32xf32>
    %c0_7 = arith.constant 0 : index
    %c0_8 = arith.constant 0 : index
    %7 = vector.load %arg5[%c0_7, %c0_8] : memref<1x32xf32, #tpu.memory_space<vmem>>, vector<1x32xf32>
    %8 = vector.broadcast %7 : vector<1x32xf32> to vector<16x32xf32>
    %9 = arith.addf %6, %8 : vector<16x32xf32>
    %cst_9 = arith.constant 0.000000e+00 : f32
    %10 = vector.broadcast %cst_9 : f32 to vector<16x32xf32>
    %11 = arith.maximumf %9, %10 : vector<16x32xf32>
    %c0_10 = arith.constant 0 : index
    %c0_11 = arith.constant 0 : index
    %12 = vector.load %arg6[%c0_10, %c0_11] : memref<32x32xf32, #tpu.memory_space<vmem>>, vector<32x32xf32>
    %cst_12 = arith.constant dense<0.000000e+00> : vector<16x32xf32>
    %13 = tpu.matmul %11, %12, %cst_12 {dimension_numbers = #tpu.dot_dimension_numbers<[1], [0], [0], [1], [0, 0, 1, 1], [], []>} : vector<16x32xf32>, vector<32x32xf32>, vector<16x32xf32> -> vector<16x32xf32>
    %c0_13 = arith.constant 0 : index
    %c0_14 = arith.constant 0 : index
    %14 = vector.load %arg7[%c0_13, %c0_14] : memref<1x32xf32, #tpu.memory_space<vmem>>, vector<1x32xf32>
    %15 = vector.broadcast %14 : vector<1x32xf32> to vector<16x32xf32>
    %16 = arith.addf %13, %15 : vector<16x32xf32>
    %cst_15 = arith.constant dense<0.000000e+00> : vector<16x32xf32>
    %17 = tpu.matmul %2, %16, %cst_15 {dimension_numbers = #tpu.dot_dimension_numbers<[1], [0], [0], [1], [0, 0, 1, 1], [], []>} : vector<16x16xf32>, vector<16x32xf32>, vector<16x32xf32> -> vector<16x32xf32>
    %18 = tpu.concatenate %17, %16 in 1 : vector<16x32xf32>, vector<16x32xf32> -> vector<16x64xf32>
    %c0_16 = arith.constant 0 : index
    %c0_17 = arith.constant 0 : index
    %19 = vector.load %arg8[%c0_16, %c0_17] : memref<64x8xf32, #tpu.memory_space<vmem>>, vector<64x8xf32>
    %cst_18 = arith.constant dense<0.000000e+00> : vector<16x8xf32>
    %20 = tpu.matmul %18, %19, %cst_18 {dimension_numbers = #tpu.dot_dimension_numbers<[1], [0], [0], [1], [0, 0, 1, 1], [], []>} : vector<16x64xf32>, vector<64x8xf32>, vector<16x8xf32> -> vector<16x8xf32>
    %c0_19 = arith.constant 0 : index
    %c0_20 = arith.constant 0 : index
    %21 = vector.load %arg9[%c0_19, %c0_20] : memref<1x8xf32, #tpu.memory_space<vmem>>, vector<1x8xf32>
    %22 = vector.broadcast %21 : vector<1x8xf32> to vector<16x8xf32>
    %23 = arith.addf %20, %22 : vector<16x8xf32>
    %24 = arith.addf %23, %1 : vector<16x8xf32>
    %cst_21 = arith.constant 0.000000e+00 : f32
    %25 = vector.broadcast %cst_21 : f32 to vector<16x8xf32>
    %26 = arith.maximumf %24, %25 : vector<16x8xf32>
    %c0_22 = arith.constant 0 : index
    %c0_23 = arith.constant 0 : index
    %27 = vector.load %arg13[%c0_22, %c0_23] : memref<16x8xf32, #tpu.memory_space<vmem>>, vector<16x8xf32>
    tpu.vector_store %arg13[%c0_22, %c0_23], %26 {strides = array<i32>} : memref<16x8xf32, #tpu.memory_space<vmem>>, vector<16x8xf32>,
    %c0_24 = arith.constant 0 : index
    %28 = memref.load %arg1[%c0_24] : memref<4xi32, #tpu.memory_space<smem>>
    %29 = arith.index_cast %28 : i32 to index
    %c0_25 = arith.constant 0 : index
    %30 = vector.load %arg13[%29, %c0_25] : memref<16x8xf32, #tpu.memory_space<vmem>>, vector<1x8xf32>
    %c0_26 = arith.constant 0 : index
    %c0_27 = arith.constant 0 : index
    %31 = vector.load %arg14[%c0_26, %c0_27] : memref<4x8xf32, #tpu.memory_space<vmem>>, vector<1x8xf32>
    tpu.vector_store %arg14[%c0_26, %c0_27], %30 {strides = array<i32>} : memref<4x8xf32, #tpu.memory_space<vmem>>, vector<1x8xf32>,
    %c1 = arith.constant 1 : index
    %32 = memref.load %arg1[%c1] : memref<4xi32, #tpu.memory_space<smem>>
    %33 = arith.index_cast %32 : i32 to index
    %c0_28 = arith.constant 0 : index
    %34 = vector.load %arg13[%33, %c0_28] : memref<16x8xf32, #tpu.memory_space<vmem>>, vector<1x8xf32>
    %c1_29 = arith.constant 1 : index
    %c0_30 = arith.constant 0 : index
    %35 = vector.load %arg14[%c1_29, %c0_30] : memref<4x8xf32, #tpu.memory_space<vmem>>, vector<1x8xf32>
    tpu.vector_store %arg14[%c1_29, %c0_30], %34 {strides = array<i32>} : memref<4x8xf32, #tpu.memory_space<vmem>>, vector<1x8xf32>,
    %c2 = arith.constant 2 : index
    %36 = memref.load %arg1[%c2] : memref<4xi32, #tpu.memory_space<smem>>
    %37 = arith.index_cast %36 : i32 to index
    %c0_31 = arith.constant 0 : index
    %38 = vector.load %arg13[%37, %c0_31] : memref<16x8xf32, #tpu.memory_space<vmem>>, vector<1x8xf32>
    %c2_32 = arith.constant 2 : index
    %c0_33 = arith.constant 0 : index
    %39 = vector.load %arg14[%c2_32, %c0_33] : memref<4x8xf32, #tpu.memory_space<vmem>>, vector<1x8xf32>
    tpu.vector_store %arg14[%c2_32, %c0_33], %38 {strides = array<i32>} : memref<4x8xf32, #tpu.memory_space<vmem>>, vector<1x8xf32>,
    %c3 = arith.constant 3 : index
    %40 = memref.load %arg1[%c3] : memref<4xi32, #tpu.memory_space<smem>>
    %41 = arith.index_cast %40 : i32 to index
    %c0_34 = arith.constant 0 : index
    %42 = vector.load %arg13[%41, %c0_34] : memref<16x8xf32, #tpu.memory_space<vmem>>, vector<1x8xf32>
    %c3_35 = arith.constant 3 : index
    %c0_36 = arith.constant 0 : index
    %43 = vector.load %arg14[%c3_35, %c0_36] : memref<4x8xf32, #tpu.memory_space<vmem>>, vector<1x8xf32>
    tpu.vector_store %arg14[%c3_35, %c0_36], %42 {strides = array<i32>} : memref<4x8xf32, #tpu.memory_space<vmem>>, vector<1x8xf32>,
    %c0_37 = arith.constant 0 : index
    %c0_38 = arith.constant 0 : index
    %44 = vector.load %arg14[%c0_37, %c0_38] : memref<4x8xf32, #tpu.memory_space<vmem>>, vector<4x8xf32>
    %c0_39 = arith.constant 0 : index
    %c0_40 = arith.constant 0 : index
    %45 = vector.load %arg10[%c0_39, %c0_40] : memref<8x8xf32, #tpu.memory_space<vmem>>, vector<8x8xf32>
    %cst_41 = arith.constant dense<0.000000e+00> : vector<4x8xf32>
    %46 = tpu.matmul %44, %45, %cst_41 {dimension_numbers = #tpu.dot_dimension_numbers<[1], [0], [0], [1], [0, 0, 1, 1], [], []>} : vector<4x8xf32>, vector<8x8xf32>, vector<4x8xf32> -> vector<4x8xf32>
    %c0_42 = arith.constant 0 : index
    %c0_43 = arith.constant 0 : index
    %47 = vector.load %arg11[%c0_42, %c0_43] : memref<1x8xf32, #tpu.memory_space<vmem>>, vector<1x8xf32>
    %48 = vector.broadcast %47 : vector<1x8xf32> to vector<4x8xf32>
    %49 = arith.addf %46, %48 : vector<4x8xf32>
    %c0_44 = arith.constant 0 : index
    %c0_45 = arith.constant 0 : index
    %c0_46 = arith.constant 0 : index
    %50 = vector.load %arg12[%c0_44, %c0_45, %c0_46] : memref<1x4x8xf32, #tpu.memory_space<vmem>>, vector<1x4x8xf32>
    %51 = vector.shape_cast %50 : vector<1x4x8xf32> to vector<4x8xf32>
    %52 = vector.shape_cast %49 : vector<4x8xf32> to vector<1x4x8xf32>
    tpu.vector_store %arg12[%c0_44, %c0_45, %c0_46], %52 {strides = array<i32>} : memref<1x4x8xf32, #tpu.memory_space<vmem>>, vector<1x4x8xf32>,
    return
  }
  func.func @transform_0(%arg0: i32, %arg1: memref<4xi32, #tpu.memory_space<smem>>) -> (i32, i32, i32) {
    %c0_i32 = arith.constant 0 : i32
    %c0_i32_0 = arith.constant 0 : i32
    %c0_i32_1 = arith.constant 0 : i32
    return %arg0, %c0_i32, %c0_i32_0 : i32, i32, i32
  }
  func.func @transform_1(%arg0: i32, %arg1: memref<4xi32, #tpu.memory_space<smem>>) -> (i32, i32) {
    %c0_i32 = arith.constant 0 : i32
    %c0_i32_0 = arith.constant 0 : i32
    %c0_i32_1 = arith.constant 0 : i32
    return %c0_i32, %c0_i32_0 : i32, i32
  }
  func.func @transform_2(%arg0: i32, %arg1: memref<4xi32, #tpu.memory_space<smem>>) -> (i32, i32) {
    %c0_i32 = arith.constant 0 : i32
    %c0_i32_0 = arith.constant 0 : i32
    %c0_i32_1 = arith.constant 0 : i32
    return %c0_i32, %c0_i32_0 : i32, i32
  }
  func.func @transform_3(%arg0: i32, %arg1: memref<4xi32, #tpu.memory_space<smem>>) -> (i32, i32) {
    %c0_i32 = arith.constant 0 : i32
    %c0_i32_0 = arith.constant 0 : i32
    %c0_i32_1 = arith.constant 0 : i32
    return %c0_i32, %c0_i32_0 : i32, i32
  }
  func.func @transform_4(%arg0: i32, %arg1: memref<4xi32, #tpu.memory_space<smem>>) -> (i32, i32) {
    %c0_i32 = arith.constant 0 : i32
    %c0_i32_0 = arith.constant 0 : i32
    %c0_i32_1 = arith.constant 0 : i32
    return %c0_i32, %c0_i32_0 : i32, i32
  }
  func.func @transform_5(%arg0: i32, %arg1: memref<4xi32, #tpu.memory_space<smem>>) -> (i32, i32) {
    %c0_i32 = arith.constant 0 : i32
    %c0_i32_0 = arith.constant 0 : i32
    %c0_i32_1 = arith.constant 0 : i32
    return %c0_i32, %c0_i32_0 : i32, i32
  }
  func.func @transform_6(%arg0: i32, %arg1: memref<4xi32, #tpu.memory_space<smem>>) -> (i32, i32) {
    %c0_i32 = arith.constant 0 : i32
    %c0_i32_0 = arith.constant 0 : i32
    %c0_i32_1 = arith.constant 0 : i32
    return %c0_i32, %c0_i32_0 : i32, i32
  }
  func.func @transform_7(%arg0: i32, %arg1: memref<4xi32, #tpu.memory_space<smem>>) -> (i32, i32) {
    %c0_i32 = arith.constant 0 : i32
    %c0_i32_0 = arith.constant 0 : i32
    %c0_i32_1 = arith.constant 0 : i32
    return %c0_i32, %c0_i32_0 : i32, i32
  }
  func.func @transform_8(%arg0: i32, %arg1: memref<4xi32, #tpu.memory_space<smem>>) -> (i32, i32) {
    %c0_i32 = arith.constant 0 : i32
    %c0_i32_0 = arith.constant 0 : i32
    %c0_i32_1 = arith.constant 0 : i32
    return %c0_i32, %c0_i32_0 : i32, i32
  }
  func.func @transform_9(%arg0: i32, %arg1: memref<4xi32, #tpu.memory_space<smem>>) -> (i32, i32) {
    %c0_i32 = arith.constant 0 : i32
    %c0_i32_0 = arith.constant 0 : i32
    %c0_i32_1 = arith.constant 0 : i32
    return %c0_i32, %c0_i32_0 : i32, i32
  }
  func.func @transform_10(%arg0: i32, %arg1: memref<4xi32, #tpu.memory_space<smem>>) -> (i32, i32, i32) {
    %c0_i32 = arith.constant 0 : i32
    %c0_i32_0 = arith.constant 0 : i32
    %c0_i32_1 = arith.constant 0 : i32
    return %arg0, %c0_i32, %c0_i32_0 : i32, i32, i32
  }
}

</mosaic_0001>

<bundles_post_ra>
// kernel: basic_gcn_pallas.1
= control target key start
LH: loop header
LB: loop body
LE: loop exit
PB: predicated region body
PF: predicated region fallthrough
CT: control target
= control target key end

     0   :  { %s1356_s0 = inlined_call_operand.vmem [shape: s32[4], index: 0, kind: input, shape index: {}]   ;;  %s1357_s1 = inlined_call_operand.vmem [shape: f32[2,16,8], index: 1, kind: input, shape index: {}]   ;;  %s1358_s2 = inlined_call_operand.vmem [shape: f32[16,16], index: 2, kind: input, shape index: {}]   ;;  %s1359_s3 = inlined_call_operand.vmem [shape: f32[16,32], index: 3, kind: input, shape index: {}]   ;;  %s1360_s4 = inlined_call_operand.vmem [shape: f32[1,32], index: 4, kind: input, shape index: {}]   ;;  %s1361_s5 = inlined_call_operand.vmem [shape: f32[32,32], index: 5, kind: input, shape index: {}]   ;;  %s1362_s6 = inlined_call_operand.vmem [shape: f32[1,32], index: 6, kind: input, shape index: {}]   ;;  %s1363_s7 = inlined_call_operand.vmem [shape: f32[64,8], index: 7, kind: input, shape index: {}]   ;;  %s1364_s8 = inlined_call_operand.vmem [shape: f32[1,8], index: 8, kind: input, shape index: {}]   ;;  %s1365_s9 = inlined_call_operand.vmem [shape: f32[8,8], index: 9, kind: input, shape index: {}]   ;;  %s1366_s10 = inlined_call_operand.vmem [shape: f32[1,8], index: 10, kind: input, shape index: {}]   ;;  %s1367_s11 = inlined_call_operand.vmem [shape: f32[2,4,8], index: 11, kind: output, shape index: {}]  }
   0x1   :  { %s16_s19 = sshll.u32 %s1356_s0, 4  ;;  %s17_s19 = int_to_ptr.vmem [resolvable:$true] %s16_s19 }
   0x2   :  { %s1157_s20 = scalar_lea.vmem %s17_s19, 16  ;;  %p1162_p1 = scmp.lt.s32.totalorder %s17_s19, %s17_s19 }
   0x3   :  { %p1158_p0 = scmp.ne.s32.totalorder %s17_s19, %s1157_s20  ;;  %p1163_p2 = scmp.lt.s32.totalorder %s1157_s20, %s1157_s20 }
   0x5   :  { %p1164_p3 = por %p1163_p2, %p1162_p1 }
   0x7   :  { %p1165_p4 = pnand %p1164_p3, %p1158_p0 }
   0x9   :  { %1168 = shalt.err (!%p1165_p4)  }
   0xa   :  { %s1179_s21 = smov [#allocation5]  }
   0xb   :  { %19 = dma.vmem_to_smem %s17_s19, 16, %s1179_s21, [#allocation4] }
   0xc   :  { %1173 = dma.done.wait [#allocation4], 16 }
   0xd   :  { %1174 = vsyncadd [#allocation4], 4294967280 }
   0xe   :  { %21 = sfence }
   0xf   :  { %s1247_s22 = smov 0  }
  0x10 LB: > { %s993_s0 = sadd.s32 4294967295, %s1177_s22   ;;  %p997_p5 = scmp.ge.s32.totalorder %s1177_s22, 1  ;;  %s1177_s22 = sphi %s1247_s22, %s27_s22  }
  0x11   : > { %p319_p6 = scmp.lt.s32.totalorder %s1177_s22, 3 }
  0x13   : > { %p320_p7 = pnand %p997_p5, %p319_p6 }
  0x14   : > { %p356_p8 = scmp.lt.s32.totalorder (!%p320_p7), %s993_s0, 1  ;;  %v367_v0 = vld [vmem:[%s1358_s2] sm:$0xff] (!%p320_p7)  ;;  %vm369_vm0 = vcmask (!%p320_p7), 130048   ;;  %v463_v2 = vld [vmem:[%s1359_s3 + $0x8] sm:$0xff] (!%p320_p7)  ;;  %s1180_s14 = smov (!%p320_p7), 8   ;;  %vm459_vm1 = vcmask (!%p320_p7), 64512  }
  0x15   : > { %323 = sbr.rel (%p320_p7) target bundleno = 1360 (0x550), region = 60  ;;  %1056 = vmatprep.mubr.msk.f32.mxu0 (!%p320_p7), %vm369_vm0, %v367_v0  ;;  %1081 = vmatprep.mubr.msk.f32.mxu1 (!%p320_p7), %vm369_vm0, %v367_v0  ;;  %v462_v1 = vld [vmem:[%s1359_s3] sm:$0xff] (!%p320_p7)  ;;  %v368_v7 = vld [vmem:[%s1358_s2 + $0x8] sm:$0xff] (!%p320_p7)  ;;  %v556_v17 = vld [vmem:[%s1361_s5 + $0x10] sm:$0xff] (!%p320_p7)  ;;  %vm565_vm2 = vcmask (!%p320_p7), 261120   ;;  %s1181_s15 = smov (!%p320_p7), 32  }
  0x16   : > { %v1112_v6 = vpack.c.bf16 (!%p320_p7), %v463_v2, %v462_v1  ;;  %v554_v8 = vld [vmem:[%s1361_s5] sm:$0xff] (!%p320_p7)  ;;  %v555_v9 = vld [vmem:[%s1361_s5 + $0x8] sm:$0xff] (!%p320_p7)  ;;  %v557_v18 = vld [vmem:[%s1361_s5 + $0x18] sm:$0xff] (!%p320_p7)  ;;  %vm747_vm3 = vcmask (!%p320_p7), 523264   ;;  %v1182_v52 = vmov (!%p320_p7), 0.0   ;;  %vm1183_vm4 = vmmov (!%p320_p7), 0  }
  0x17   : > { %v1116_v10 = vpack.c.bf16 (!%p320_p7), %v555_v9, %v554_v8  ;;  %v1120_v19 = vpack.c.bf16 (!%p320_p7), %v557_v18, %v556_v17  ;;  %v1003_v20 = vld [vmem:[%s1360_s4] ss:$0 sm:$0xff] (!%p320_p7)  ;;  %v733_v32 = vld [vmem:[%s1363_s7 + $0x8] sm:$0xff] (!%p320_p7)  ;;  %v734_v36 = vld [vmem:[%s1363_s7 + $0x10] sm:$0xff] (!%p320_p7)  ;;  %s1015_s16 = sld [smem:[#allocation5 + $0x2]] (!%p320_p7)  ;;  %s1016_s17 = sld [smem:[#allocation5 + $0x3]] (!%p320_p7) }
  0x18   : > { %v1006_v27 = vld [vmem:[%s1362_s6] ss:$0 sm:$0xff] (!%p320_p7)  ;;  %v735_v37 = vld [vmem:[%s1363_s7 + $0x18] sm:$0xff] (!%p320_p7)  ;;  %v737_v40 = vld [vmem:[%s1363_s7 + $0x28] sm:$0xff] (!%p320_p7)  ;;  %vm838_vm5 = vcmask (!%p320_p7), 57344   ;;  %vm934_vm6 = vcmask (!%p320_p7), 60416  }
  0x19   : > { %v732_v31 = vld [vmem:[%s1363_s7] sm:$0xff] (!%p320_p7)  ;;  %v1132_v38 = vpack.c.bf16 (!%p320_p7), %v735_v37, %v734_v36  ;;  %v738_v42 = vld [vmem:[%s1363_s7 + $0x30] sm:$0xff] (!%p320_p7)  ;;  %v739_v43 = vld [vmem:[%s1363_s7 + $0x38] sm:$0xff] (!%p320_p7) }
  0x1a   : > { %v1128_v35 = vpack.c.bf16 (!%p320_p7), %v733_v32, %v732_v31  ;;  %v736_v39 = vld [vmem:[%s1363_s7 + $0x20] sm:$0xff] (!%p320_p7)  ;;  %v1140_v44 = vpack.c.bf16 (!%p320_p7), %v739_v43, %v738_v42 }
  0x1b   : > { %v1136_v41 = vpack.c.bf16 (!%p320_p7), %v737_v40, %v736_v39  ;;  %v853_v51 = vld [vmem:[%s1365_s9] sm:$0xff] (!%p320_p7) }
  0x1c   : > { %s1369_s0 = smov (!%p356_p8, %s993_s0), 1  ;;  %v1011_v53 = vld [vmem:[%s1364_s8] ss:$0 sm:$0xff] }
  0x1d   : > { %s1021_s25 = sshll.u32 %s1369_s0, 4  ;;  %s845_s20 = scalar_lea.vmem [#allocation2], %s1015_s16 }
  0x1e   : > { %s360_s13 = scalar_lea.vmem %s1357_s1, %s1021_s25  ;;  %s849_s21 = scalar_lea.vmem [#allocation2], %s1016_s17 }
  0x1f   : > { %v1272_v3 = vld [vmem:[%s360_s13] sm:$0xff]  ;;  %v1274_v4 = vld [vmem:[%s360_s13 + $0x8] sm:$0xff]  ;;  %s1000_s23 = sshll.u32 %s1369_s0, 2 }
  0x20   : > { %v1108_v5 = vpack.c.bf16 %v1274_v4, %v1272_v3  ;;  %453 = vrot.lane.b32.xlu0 %v1272_v3, %s1180_s14  ;;  %s364_s28 = scalar_lea.vmem %s1367_s11, %s1000_s23 }
  0x22   : > { %1109 = vmatprep.subr.bf16.mxu0 %v1108_v5 }
  0x23   : > { %1111 = vmatpush3.bf16.msra.mxu0 %v1108_v5 }
  0x24   : > { %455 = vrot.lane.b32.xlu0 %v1274_v4, %s1180_s14  ;;  %1113 = vmatprep.subr.bf16.mxu0 %v1112_v6  ;;  %s835_s14 = sld [smem:[#allocation5]] }
  0x26   : > { %1057 = vmatmul.mubr.msk.f32.vlgmr.msra.gmra.mrb[0].mxu0 %vm369_vm0, %v368_v7 }
  0x27   : > { %1115 = vmatpush3.bf16.msra.mxu0 %v1112_v6 }
  0x28   : > { %1117 = vmatprep.subr.bf16.mxu0 %v1116_v10 }
  0x2a   : > { %s836_s18 = scalar_lea.vmem [#allocation2], %s835_s14 }
  0x92   : > { %v454_v11 = vpop.permute.xlu0 %453 }
  0x96   : > { %v456_v12 = vpop.permute.xlu0 %455 }
  0xf9   : > { %v1058_v13 = vpop.f32.mrb[0].mxu0 }
  0xfa   : > { %v442_v14 = vpop.f32.mrb[1].mxu0  ;;  %v461_v16 = vsel %vm459_vm1, %v1058_v13, %v456_v12 }
  0xfb   : > { %v460_v15 = vsel %vm459_vm1, %v442_v14, %v454_v11 }
  0xfc   : > { %1063 = vmatprep.mubr.msk.f32.mxu0 %vm369_vm0, %v460_v15 }
  0xfd   : > { %1064 = vmatmul.mubr.msk.f32.vlgmr.msra.gmra.mrb[2].mxu0 %vm369_vm0, %v461_v16 }
  0xfe   : > { %1119 = vmatpush3.bf16.msra.mxu0 %v1116_v10 }
  0xff   : > { %1121 = vmatprep.subr.bf16.mxu0 %v1120_v19 }
 0x102   : > { %1123 = vmatpush3.bf16.msra.mxu0 %v1120_v19 }
 0x103   : > { %1103 = vmatprep.subr.mxu0 %v1182_v52 }
 0x1d0   : > { %v1065_v21 = vpop.f32.mrb[2].mxu0 }
 0x1d1   : > { %v549_v22 = vadd.f32 %v1065_v21, %v1003_v20  ;;  %v543_v23 = vpop.f32.mrb[3].mxu0 }
 0x1d2   : > { %v544_v24 = vadd.f32 %v1003_v20, %v543_v23 }
 0x1d3   : > { %v553_v26 = vmax.f32 %v549_v22, 0.0 }
 0x1d4   : > { %v552_v25 = vmax.f32 %v544_v24, 0.0 }
 0x1d6   : > { %1074 = vmatprep.mubr.msk.f32.mxu0 %vm565_vm2, %v552_v25 }
 0x1d7   : > { %1075 = vmatmul.mubr.msk.f32.vlgmr.msra.gmra.mrb[4].mxu0 %vm565_vm2, %v553_v26 }
 0x1d8   : > { %1105 = vmatprep.mubr.msk.f32.mxu0 %vm1183_vm4, %v1182_v52  ;;  %1104 = vmatpush3.msra.mxu0 %v853_v51 }
 0x2aa   : > { %v1076_v28 = vpop.f32.mrb[4].mxu0 }
 0x2ab   : > { %v644_v29 = vadd.f32 %v1076_v28, %v1006_v27  ;;  %v638_v30 = vpop.f32.mrb[5].mxu0 }
 0x2ac   : > { %v639_v33 = vadd.f32 %v1006_v27, %v638_v30 }
 0x2ae   : > { %724 = vrot.lane.b32.xlu1 %v639_v33, %s1181_s15  ;;  %v1124_v34 = vpack.c.bf16 %v644_v29, %v639_v33 }
 0x2b0   : > { %1125 = vmatprep.subr.bf16.mxu1 %v1124_v34 }
 0x2b1   : > { %1127 = vmatpush3.bf16.msra.mxu1 %v1124_v34 }
 0x2b2   : > { %726 = vrot.lane.b32.xlu1 %v644_v29, %s1181_s15  ;;  %1129 = vmatprep.subr.bf16.mxu1 %v1128_v35  ;;  %s1014_s15 = sld [smem:[#allocation5 + $0x1]] }
 0x2b4   : > { %1082 = vmatmul.mubr.msk.f32.vlgmr.msra.gmra.mrb[0].mxu1 %vm369_vm0, %v368_v7 }
 0x2b5   : > { %1131 = vmatpush3.bf16.msra.mxu1 %v1128_v35 }
 0x2b6   : > { %1133 = vmatprep.subr.bf16.mxu1 %v1132_v38 }
 0x2b8   : > { %s841_s19 = scalar_lea.vmem [#allocation2], %s1014_s15 }
 0x2b9   : > { %1135 = vmatpush3.bf16.msra.mxu1 %v1132_v38 }
 0x2ba   : > { %1137 = vmatprep.subr.bf16.mxu1 %v1136_v41 }
 0x2bd   : > { %1139 = vmatpush3.bf16.msra.mxu1 %v1136_v41 }
 0x2be   : > { %1141 = vmatprep.subr.bf16.mxu1 %v1140_v44 }
 0x2c1   : > { %1143 = vmatpush3.bf16.msra.mxu1 %v1140_v44 }
 0x320   : > { %v725_v45 = vpop.permute.xlu1 %724 }
 0x324   : > { %v727_v48 = vpop.permute.xlu1 %726 }
 0x387   : > { %v1083_v46 = vpop.f32.mrb[0].mxu1 }
 0x388   : > { %v713_v47 = vpop.f32.mrb[1].mxu1  ;;  %v731_v50 = vsel %vm565_vm2, %v1083_v46, %v727_v48 }
 0x389   : > { %v730_v49 = vsel %vm565_vm2, %v713_v47, %v725_v45 }
 0x38a   : > { %1100 = vmatprep.mubr.msk.f32.mxu1 %vm747_vm3, %v730_v49 }
 0x38b   : > { %1101 = vmatmul.mubr.msk.f32.vlgmr.msra.gmra.mrb[2].mxu1 %vm747_vm3, %v731_v50 }
 0x45e   : > { %v1102_v54 = vpop.f32.mrb[2].mxu1 }
 0x45f   : > { %v826_v55 = vadd.f32 %v1102_v54, %v1011_v53  ;;  %v820_v56 = vpop.f32.mrb[3].mxu1 }
 0x460   : > { %v821_v57 = vadd.f32 %v1011_v53, %v820_v56 }
 0x461   : > { %v830_v58 = vadd.f32 %v826_v55, %v1274_v4 }
 0x462   : > { %v829_v59 = vadd.f32 %v821_v57, %v1272_v3  ;;  %v1017_v3 = vld [vmem:[%s1366_s10] ss:$0 sm:$0xff] }
 0x463   : > { %v832_v60 = vmax.f32 %v830_v58, 0.0 }
 0x464   : > { %v831_v61 = vmax.f32 %v829_v59, 0.0 }
 0x465   : > { %834 = vst.msk [vmem:[#allocation2 + $0x8] sm:$0xff] %vm459_vm1, %v832_v60 }
 0x466   : > { %833 = vst.msk [vmem:[#allocation2] sm:$0xff] %vm459_vm1, %v831_v61 }
 0x46d   : > { %v837_v62 = vld [vmem:[%s836_s18] sm:$0x1] }
 0x46e   : > { %v842_v63 = vld [vmem:[%s841_s19] sm:$0x1]  ;;  %839 = vst.msk [vmem:[#allocation3] sm:$0x1] %vm838_vm5, %v837_v62 }
 0x46f   : > { %v846_v0 = vld [vmem:[%s845_s20] sm:$0x1]  ;;  %843 = vst.msk [vmem:[#allocation3 + $0x1] sm:$0x1] %vm838_vm5, %v842_v63 }
 0x470   : > { %v850_v1 = vld [vmem:[%s849_s21] sm:$0x1]  ;;  %847 = vst.msk [vmem:[#allocation3 + $0x2] sm:$0x1] %vm838_vm5, %v846_v0 }
 0x471   : > { %851 = vst.msk [vmem:[#allocation3 + $0x3] sm:$0x1] %vm838_vm5, %v850_v1 }
 0x478   : > { %v852_v2 = vld [vmem:[#allocation3] sm:$0xf] }
 0x479   : > { %1106 = vmatmul.mubr.msk.f32.vlgmr.msra.gmra.mrb[6].mxu0 %vm459_vm1, %v852_v2 }
 0x54c   : > { %v930_v4 = vpop.f32.mrb[6].mxu0 }
 0x54d   : > { %v931_v5 = vadd.f32 %v1017_v3, %v930_v4  ;;  %v1107_v6 = vpop.f32.mrb[7].mxu0 }
 0x54f   : > { %935 = vst.msk [vmem:[%s364_s28] sm:$0xf] %vm934_vm6, %v931_v5 }
 0x550 PF: > { %s27_s22 = sadd.s32 1, %s1177_s22  }
 0x551   : > { %p24_p9 = scmp.ge.s32.totalorder %s27_s22, 4  }
 0x553   :  { %26 = sbr.rel (!%p24_p9) target bundleno = 16 (0x10), region = 94 }

</bundles_post_ra>
